<compile_context>
chip_gen: v7x
topology: tpu7x:2x2x1
jax: 0.10.0
libtpu: 0.0.40
codegen_flags: <defaults>
</compile_context>

<pallas_src>
import functools

import jax
import jax.numpy as jnp
from jax.experimental import pallas as pl
from jax.experimental.pallas import tpu as pltpu


def _featureprompt_kernel(wp_ref, feat_ref, out_ref):
    # wp_ref  : (1, H)       VMEM — weighted-prompt row (already in feature dtype)
    # feat_ref: (block_n, H) VMEM — streaming tile of node features
    # out_ref : (block_n, H) VMEM
    out_ref[...] = (wp_ref[...] * feat_ref[...]).astype(out_ref.dtype)


def _pick_block_n(n, h, dtype, target_block_bytes=8 * 1024 * 1024):
    """Row-tile size: ~8 MiB per feature block, sublane-aligned, never over-padding."""
    itemsize = jnp.dtype(dtype).itemsize
    base = 32 if itemsize == 1 else (16 if itemsize == 2 else 8)
    if n <= base:
        return int(n)  # full-dim block is always a legal block shape
    bn = max(base, (target_block_bytes // max(h * itemsize, 1)) // base * base)
    if bn >= n:
        return int(n)  # single block covering the whole type
    return int(bn)


@functools.partial(jax.jit, static_argnames=("block_n",))
def _apply_prompt(wp_row, feat, *, block_n):
    n, h = feat.shape
    itemsize = jnp.dtype(feat.dtype).itemsize
    num_tiles = pl.cdiv(n, block_n)
    return pl.pallas_call(
        _featureprompt_kernel,
        out_shape=jax.ShapeDtypeStruct((n, h), feat.dtype),
        grid=(num_tiles,),
        in_specs=[
            # weighted-prompt row: same (only) block every step -> stays resident
            pl.BlockSpec((1, h), lambda i: (0, 0)),
            # streaming feature tile; trailing ragged block handled by Pallas
            pl.BlockSpec((block_n, h), lambda i: (i, 0)),
        ],
        out_specs=pl.BlockSpec((block_n, h), lambda i: (i, 0)),
        compiler_params=pltpu.CompilerParams(
            dimension_semantics=("parallel",),
            vmem_limit_bytes=48 * 1024 * 1024,
        ),
        cost_estimate=pl.CostEstimate(
            flops=n * h,
            transcendentals=0,
            bytes_accessed=2 * n * h * itemsize + h * itemsize,
        ),
    )(wp_row, feat)


class FeaturePromptPallas:
    """JAX/Pallas port of featureprompt (dict-of-node-types module)."""

    def __init__(self, ntypes, prompt1, prompt2, weight=None):
        # weighted_prompt(2).reset_parameters(): weight[0,0]=0.1, weight[0,1]=1.0.
        # Pass `weight` explicitly if the trained parameter should be used.
        if weight is None:
            weight = [[0.1, 1.0]]
        self.weight = jnp.asarray(weight, dtype=jnp.float32)
        # Hoisted weighted-prompt rows (f32, computed once per node type).
        self.wp = {}
        for nt in ntypes:
            pr = jnp.concatenate([prompt1[nt], prompt2[nt]], axis=0)          # (2, H)
            self.wp[nt] = jnp.matmul(self.weight, pr.astype(jnp.float32))     # (1, H)

    def __call__(self, feature):
        out = {}
        # Match PyTorch: iterate over feature keys; missing prompt key -> KeyError.
        for key, f in feature.items():
            # Pre-cast the prompt row once; output keeps the feature dtype.
            # (PyTorch type-promotion would return f32 for half inputs; here the
            #  result is kept in the feature dtype — documented minor difference.)
            wp = self.wp[key].astype(f.dtype)
            n, h = f.shape
            block_n = _pick_block_n(n, h, f.dtype)
            # TODO(synk): optionally donate `f` via input_output_aliases on v5e
            # when the caller no longer needs the raw features.
            out[key] = _apply_prompt(wp, f, block_n=block_n)
        return out


if __name__ == "__main__":
    key = jax.random.PRNGKey(0)
    H = 128
    ntypes = ["drug", "disease", "gene/protein"]
    n_nodes = {"drug": 64, "disease": 30, "gene/protein": 48}

    k1, k2, k3 = jax.random.split(key, 3)
    prompt1, prompt2, feature = {}, {}, {}
    for i, nt in enumerate(ntypes):
        ka = jax.random.fold_in(k1, i)
        kb = jax.random.fold_in(k2, i)
        kc = jax.random.fold_in(k3, i)
        prompt1[nt] = jax.random.normal(ka, (1, H), dtype=jnp.float32)
        prompt2[nt] = jax.random.normal(kb, (1, H), dtype=jnp.float32)
        feature[nt] = jax.random.normal(kc, (n_nodes[nt], H), dtype=jnp.float32)

    mod = FeaturePromptPallas(ntypes, prompt1, prompt2)
    out = mod(feature)
    out = jax.tree_util.tree_map(jax.block_until_ready, out)

    # Reference check against plain-JAX semantics of the PyTorch module.
    ok = True
    for nt in ntypes:
        pr = jnp.concatenate([prompt1[nt], prompt2[nt]], axis=0)       # (2, H)
        wrow = jnp.matmul(mod.weight, pr)                              # (1, H)
        ref = wrow * feature[nt]                                       # (N, H)
        ok = ok and (out[nt].shape == feature[nt].shape)
        ok = ok and bool(jnp.allclose(out[nt], ref, rtol=1e-5, atol=1e-5))

    print("KERNEL_OK" if ok else "MISMATCH")
</pallas_src>

<mosaic_0001>
module attributes {stable_mosaic.version = 11 : i64} {
  func.func @_featureprompt_kernel(%arg0: i32, %arg1: memref<1x128xf32, #tpu.memory_space<vmem>>, %arg2: memref<64x128xf32, #tpu.memory_space<vmem>>, %arg3: memref<64x128xf32, #tpu.memory_space<vmem>>) attributes {dimension_semantics = [#tpu.dimension_semantics<parallel>], iteration_bounds = array<i64: 1>, scalar_prefetch = 0 : i64, scratch_operands = 0 : i64, tpu.core_type = #tpu.core_type<tc>, window_params = [{pipeline_mode = #tpu.pipeline_mode<synchronous>, transform_indices = @transform_0, window_bounds = array<i64: 1, 128>}, {transform_indices = @transform_1, window_bounds = array<i64: 64, 128>}, {transform_indices = @transform_2, window_bounds = array<i64: 64, 128>}]} {
    %c0 = arith.constant 0 : index
    %c0_0 = arith.constant 0 : index
    %0 = vector.load %arg1[%c0, %c0_0] : memref<1x128xf32, #tpu.memory_space<vmem>>, vector<1x128xf32>
    %c0_1 = arith.constant 0 : index
    %c0_2 = arith.constant 0 : index
    %1 = vector.load %arg2[%c0_1, %c0_2] : memref<64x128xf32, #tpu.memory_space<vmem>>, vector<64x128xf32>
    %2 = vector.broadcast %0 : vector<1x128xf32> to vector<64x128xf32>
    %3 = arith.mulf %2, %1 : vector<64x128xf32>
    %c0_3 = arith.constant 0 : index
    %c0_4 = arith.constant 0 : index
    %4 = vector.load %arg3[%c0_3, %c0_4] : memref<64x128xf32, #tpu.memory_space<vmem>>, vector<64x128xf32>
    tpu.vector_store %arg3[%c0_3, %c0_4], %3 {strides = array<i32>} : memref<64x128xf32, #tpu.memory_space<vmem>>, vector<64x128xf32>,
    return
  }
  func.func @transform_0(%arg0: i32) -> (i32, i32) {
    %c0_i32 = arith.constant 0 : i32
    %c0_i32_0 = arith.constant 0 : i32
    %c0_i32_1 = arith.constant 0 : i32
    return %c0_i32, %c0_i32_0 : i32, i32
  }
  func.func @transform_1(%arg0: i32) -> (i32, i32) {
    %c0_i32 = arith.constant 0 : i32
    %c0_i32_0 = arith.constant 0 : i32
    return %arg0, %c0_i32 : i32, i32
  }
  func.func @transform_2(%arg0: i32) -> (i32, i32) {
    %c0_i32 = arith.constant 0 : i32
    %c0_i32_0 = arith.constant 0 : i32
    return %arg0, %c0_i32 : i32, i32
  }
}

</mosaic_0001>

<bundles_post_ra>
// kernel: _apply_prompt.1
= control target key start
LH: loop header
LB: loop body
LE: loop exit
PB: predicated region body
PF: predicated region fallthrough
CT: control target
= control target key end

     0   :  { %7 = vsyncpa [#allocation3], 0  ;;  %s234_s0 = inlined_call_operand.hbm [shape: f32[1,128], index: 0, kind: input, shape index: {}]   ;;  %s235_s1 = inlined_call_operand.hbm [shape: f32[64,128], index: 1, kind: input, shape index: {}]   ;;  %s236_s2 = inlined_call_operand.hbm [shape: f32[64,128], index: 2, kind: output, shape index: {}]  }
   0x1   :  { %8 = vsyncpa [#allocation6], 0 }
   0x2   :  { %9 = vsyncpa [#allocation4], 0  ;;  %s165_s9 = smov [#allocation2]   ;;  %s166_s11 = smov [#allocation5]  }
   0x3   :  { %s16_s10 = sshll.u32 %s165_s9, 4  ;;  %s25_s12 = sshll.u32 %s166_s11, 4  ;;  %s17_s10 = int_to_ptr.vmem [resolvable:$true] %s16_s10  ;;  %s185_s12 = int_to_ptr.vmem [resolvable:$true] %s25_s12 }
   0x4   :  { %s93_s15 = scalar_lea.hbm %s234_s0, 16 }
   0x5   :  { %p94_p0 = scmp.ne.s32.totalorder %s234_s0, %s93_s15  ;;  %p97_p1 = scmp.lt.u32.totalorder %s93_s15, %s234_s0 }
   0x7   :  { %p99_p2 = pnand %p97_p1, %p94_p0 }
   0x9   :  { %102 = shalt.err (!%p99_p2)
}
   0xa   :  { %s103_s20 = scalar_lea.vmem %s17_s10, 16  ;;  %s107_s21 = scalar_lea.vmem %s17_s10, 32 }
   0xb   :  { %p104_p3 = scmp.ne.s32.totalorder %s17_s10, %s103_s20  ;;  %p108_p4 = scmp.lt.s32.totalorder %s17_s10, %s17_s10 }
   0xc   :  { %p109_p5 = scmp.lt.s32.totalorder %s107_s21, %s103_s20 }
   0xe   :  { %p110_p6 = por %p109_p5, %p108_p4 }
  0x10   :  { %p111_p7 = pnand %p110_p6, %p104_p3 }
  0x12   :  { %114 = shalt.err (!%p111_p7)
}
  0x13   :  { %19 = dma.hbm_to_vmem [thread:$0]  %s234_s0, 16, %s17_s10, [#allocation3]  }
  0x14   :  { %s115_s26 = scalar_lea.hbm %s235_s1, 1024 }
  0x15   :  { %p116_p8 = scmp.ne.s32.totalorder %s235_s1, %s115_s26  ;;  %p119_p9 = scmp.lt.u32.totalorder %s115_s26, %s235_s1 }
  0x17   :  { %p121_p10 = pnand %p119_p9, %p116_p8 }
  0x19   :  { %124 = shalt.err (!%p121_p10)
}
  0x1a   :  { %s125_s3 = scalar_lea.vmem %s185_s12, 1024  ;;  %p130_p12 = scmp.lt.s32.totalorder %s185_s12, %s185_s12 }
  0x1b   :  { %p126_p11 = scmp.ne.s32.totalorder %s185_s12, %s125_s3  ;;  %p131_p13 = scmp.lt.s32.totalorder %s125_s3, %s125_s3 }
  0x1d   :  { %p132_p0 = por %p131_p13, %p130_p12 }
  0x1f   :  { %p133_p1 = pnand %p132_p0, %p126_p11 }
  0x21   :  { %136 = shalt.err (!%p133_p1)
}
  0x22   :  { %s167_s0 = smov 128   ;;  %s168_s4 = smov 8  }
  0x23   :  { %31 = dma.hbm_to_vmem [thread:$0]  %s235_s1, 1024, %s185_s12, [#allocation6], %s167_s0, %s167_s0, %s168_s4  }
  0x24   :  { %159 = dma.done.wait [#allocation3], 16  }
  0x25   :  { %160 = vsyncadd [#allocation3], 4294967280 }
  0x26   :  { %161 = dma.done.wait [#allocation6], 1024  }
  0x27   :  { %162 = vsyncadd [#allocation6], 4294966272  ;;  %v87_v0 = vld [vmem:[#allocation2] ss:$0 sm:$0xff]  ;;  %v39_v1 = vld [vmem:[#allocation5] sm:$0xff]  ;;  %s169_s7 = smov [#allocation7]  }
  0x28   :  { %v40_v2 = vld [vmem:[#allocation5 + $0x8] sm:$0xff]  ;;  %s74_s8 = sshll.u32 %s169_s7, 4  ;;  %v53_v3 = vmul.f32 %v87_v0, %v39_v1  ;;  %v41_v5 = vld [vmem:[#allocation5 + $0x10] sm:$0xff]  ;;  %v42_v6 = vld [vmem:[#allocation5 + $0x18] sm:$0xff]  ;;  %s75_s8 = int_to_ptr.vmem [resolvable:$true] %s74_s8 }
  0x29   :  { %v54_v4 = vmul.f32 %v87_v0, %v40_v2  ;;  %v43_v7 = vld [vmem:[#allocation5 + $0x20] sm:$0xff]  ;;  %v55_v8 = vmul.f32 %v87_v0, %v41_v5  ;;  %v56_v9 = vmul.f32 %v87_v0, %v42_v6  ;;  %v44_v11 = vld [vmem:[#allocation5 + $0x28] sm:$0xff]  ;;  %v45_v12 = vld [vmem:[#allocation5 + $0x30] sm:$0xff]  ;;  %s137_s1 = scalar_lea.vmem %s75_s8, 1024  ;;  %p142_p3 = scmp.lt.s32.totalorder %s75_s8, %s75_s8 }
  0x2a   :  { %v57_v10 = vmul.f32 %v87_v0, %v43_v7  ;;  %v46_v13 = vld [vmem:[#allocation5 + $0x38] sm:$0xff]  ;;  %61 = vst [vmem:[#allocation7] sm:$0xff] %v53_v3  ;;  %v58_v14 = vmul.f32 %v87_v0, %v44_v11  ;;  %v59_v15 = vmul.f32 %v87_v0, %v45_v12  ;;  %p138_p2 = scmp.ne.s32.totalorder %s75_s8, %s137_s1  ;;  %p143_p4 = scmp.lt.s32.totalorder %s137_s1, %s137_s1 }
  0x2b   :  { %62 = vst [vmem:[#allocation7 + $0x8] sm:$0xff] %v54_v4  ;;  %v60_v16 = vmul.f32 %v87_v0, %v46_v13  ;;  %63 = vst [vmem:[#allocation7 + $0x10] sm:$0xff] %v55_v8 }
  0x2c   :  { %64 = vst [vmem:[#allocation7 + $0x18] sm:$0xff] %v56_v9  ;;  %65 = vst [vmem:[#allocation7 + $0x20] sm:$0xff] %v57_v10  ;;  %p144_p5 = por %p143_p4, %p142_p3 }
  0x2d   :  { %66 = vst [vmem:[#allocation7 + $0x28] sm:$0xff] %v58_v14  ;;  %67 = vst [vmem:[#allocation7 + $0x30] sm:$0xff] %v59_v15 }
  0x2e   :  { %68 = vst [vmem:[#allocation7 + $0x38] sm:$0xff] %v60_v16  ;;  %p145_p6 = pnand %p144_p5, %p138_p2 }
  0x30   :  { %148 = shalt.err (!%p145_p6)
}
  0x31   :  { %s149_s11 = scalar_lea.hbm %s236_s2, 1024 }
  0x32   :  { %p150_p7 = scmp.ne.s32.totalorder %s236_s2, %s149_s11  ;;  %p153_p8 = scmp.lt.u32.totalorder %s149_s11, %s236_s2 }
  0x34   :  { %p155_p9 = pnand %p153_p8, %p150_p7 }
  0x36   :  { %158 = shalt.err (!%p155_p9)
}
  0x37   :  { %80 = dma.vmem_to_hbm [thread:$0]  %s75_s8, 1024, %s236_s2, [#allocation4], %s167_s0, %s167_s0, %s168_s4  }
  0x38   :  { %163 = dma.done.wait [#allocation4], 1024  }
  0x39   :  { %164 = vsyncadd [#allocation4], 4294966272 }
  0x3a   :  { %84 = vsyncpa [#allocation3], 1 }
  0x3b   :  { %85 = vsyncpa [#allocation6], 1 }
  0x3c   :  { %86 = vsyncpa [#allocation4], 1 }

</bundles_post_ra>
